<compile_context>
chip_gen: v7x
topology: tpu7x:2x2x1
jax: 0.10.0
libtpu: 0.0.40
codegen_flags: <defaults>
</compile_context>

<pallas_src>
import jax
import jax.numpy as jnp
from jax.experimental import pallas as pl
from jax.experimental.pallas import tpu as pltpu


def _make_dma_copy_kernel(bounds):
    """Build a kernel that copies src -> dst via async HBM->HBM DMA.

    `bounds` is a tuple of (start, end) Python-int ranges along axis 0, or
    None to copy the whole array with a single DMA descriptor.
    """

    def kernel(x_hbm, o_hbm, sems):
        if bounds is None:
            copies = [pltpu.make_async_copy(x_hbm, o_hbm, sems.at[0])]
        else:
            copies = [
                pltpu.make_async_copy(x_hbm.at[s:e], o_hbm.at[s:e], sems.at[i])
                for i, (s, e) in enumerate(bounds)
            ]
        # Issue every DMA first (they proceed concurrently), then wait on all.
        for cp in copies:
            cp.start()
        for cp in copies:
            cp.wait()

    return kernel


def _identity_copy(x, *, max_chunks=4, chunk_bytes_threshold=(8 << 20)):
    """Materialize an on-device copy of `x` via HBM->HBM DMA (no VMEM staging)."""
    if x.size == 0:
        return x

    nbytes = x.size * jnp.dtype(x.dtype).itemsize
    if x.ndim >= 1 and x.shape[0] >= 2 and nbytes >= chunk_bytes_threshold:
        # Large arrays: split into a few big concurrent DMAs along axis 0.
        n_chunks = min(max_chunks, x.shape[0])
        edges = [round(j * x.shape[0] / n_chunks) for j in range(n_chunks + 1)]
        bounds = tuple(
            (edges[j], edges[j + 1])
            for j in range(n_chunks)
            if edges[j + 1] > edges[j]
        )
    else:
        # Small arrays (like the demo's (16, 32)): a single whole-array DMA —
        # no grid, no pipeline prologue/epilogue, no padding, no slicing.
        bounds = None

    n_sems = 1 if bounds is None else len(bounds)

    return pl.pallas_call(
        _make_dma_copy_kernel(bounds),
        out_shape=jax.ShapeDtypeStruct(x.shape, x.dtype),
        in_specs=[pl.BlockSpec(memory_space=pl.ANY)],
        out_specs=pl.BlockSpec(memory_space=pl.ANY),
        scratch_shapes=[pltpu.SemaphoreType.DMA((n_sems,))],
    )(x)


def node_prompt_layer_sum_forward(graph_embedding, graph_len=None, weight=None,
                                  *, materialize_copy=False):
    """Reproduces node_prompt_layer_sum.forward: returns graph_embedding.

    `graph_len` and `weight` are accepted for API parity but unused, exactly
    as in the PyTorch module.  By default this is a zero-cost identity (no
    kernel, no HBM traffic) — the semantically exact and fastest
    implementation on every TPU generation.  Set materialize_copy=True if a
    distinct output buffer is required; that path runs a minimal-overhead
    HBM->HBM DMA copy kernel.
    """
    del graph_len, weight  # declared by the module but unused in forward
    if not materialize_copy:
        return graph_embedding
    return _identity_copy(graph_embedding)


if __name__ == "__main__":
    key = jax.random.PRNGKey(0)
    k_emb, k_w, k_big = jax.random.split(key, 3)

    # Small shapes consistent with the module's usage:
    #   graph_embedding: [num_nodes, hidden], graph_len: [num_graphs]
    num_nodes, hidden = 16, 32
    graph_embedding = jax.random.normal(k_emb, (num_nodes, hidden), dtype=jnp.float32)
    graph_len = jnp.array([6, 10], dtype=jnp.int32)  # unused by forward

    # Deterministic init of the (unused) (2, 2) parameter from __init__.
    weight = jax.random.normal(k_w, (2, 2), dtype=jnp.float32)

    # Default (recommended) path: pure identity, no kernel launch.
    out_fast = jax.block_until_ready(
        node_prompt_layer_sum_forward(graph_embedding, graph_len, weight))
    assert out_fast.shape == graph_embedding.shape
    assert out_fast.dtype == graph_embedding.dtype
    assert bool(jnp.all(out_fast == graph_embedding))

    # Distinct-output-buffer path: single whole-array HBM->HBM DMA.
    out_copy = jax.block_until_ready(
        node_prompt_layer_sum_forward(graph_embedding, graph_len, weight,
                                      materialize_copy=True))
    assert out_copy.shape == graph_embedding.shape
    assert out_copy.dtype == graph_embedding.dtype
    assert bool(jnp.all(out_copy == graph_embedding))

    # Also exercise the multi-chunk DMA variant (threshold forced to 0 so the
    # chunked kernel path is compiled and run on a modestly larger array).
    big = jax.random.normal(k_big, (64, 128), dtype=jnp.float32)
    out_big = jax.block_until_ready(_identity_copy(big, chunk_bytes_threshold=0))
    assert out_big.shape == big.shape
    assert out_big.dtype == big.dtype
    assert bool(jnp.all(out_big == big))

    print("KERNEL_OK")
</pallas_src>

<mosaic_0001>
module attributes {stable_mosaic.version = 11 : i64} {
  func.func @kernel(%arg0: memref<16x32xf32, #tpu.memory_space<any>>, %arg1: memref<16x32xf32, #tpu.memory_space<any>>, %arg2: memref<1x!tpu.dma_semaphore, #tpu.memory_space<semaphore_mem>>) attributes {dimension_semantics = [], scalar_prefetch = 0 : i64, scratch_operands = 1 : i64, tpu.core_type = #tpu.core_type<tc>} {
    %c0_i32 = arith.constant 0 : i32
    %0 = tpu.memref_slice %arg2[%c0_i32] : memref<1x!tpu.dma_semaphore, #tpu.memory_space<semaphore_mem>> -> memref<1x!tpu.dma_semaphore, #tpu.memory_space<semaphore_mem>>
    %1 = tpu.memref_squeeze %0 : memref<1x!tpu.dma_semaphore, #tpu.memory_space<semaphore_mem>> -> memref<!tpu.dma_semaphore, #tpu.memory_space<semaphore_mem>>
    tpu.enqueue_dma source(%arg0 : memref<16x32xf32, #tpu.memory_space<any>>) target(%arg1 : memref<16x32xf32, #tpu.memory_space<any>>) target_semaphore(%1 : memref<!tpu.dma_semaphore, #tpu.memory_space<semaphore_mem>>)
    %c0_i32_0 = arith.constant 0 : i32
    %2 = tpu.memref_slice %arg2[%c0_i32_0] : memref<1x!tpu.dma_semaphore, #tpu.memory_space<semaphore_mem>> -> memref<1x!tpu.dma_semaphore, #tpu.memory_space<semaphore_mem>>
    %3 = tpu.memref_squeeze %2 : memref<1x!tpu.dma_semaphore, #tpu.memory_space<semaphore_mem>> -> memref<!tpu.dma_semaphore, #tpu.memory_space<semaphore_mem>>
    tpu.wait_dma2 semaphore(%3 : memref<!tpu.dma_semaphore, #tpu.memory_space<semaphore_mem>>) src(%arg0 : memref<16x32xf32, #tpu.memory_space<any>>) dst(%arg1 : memref<16x32xf32, #tpu.memory_space<any>>)
    return
  }
}

</mosaic_0001>

<bundles_post_ra>
// kernel: tpu_custom_call.1
= control target key start
LH: loop header
LB: loop body
LE: loop exit
PB: predicated region body
PF: predicated region fallthrough
CT: control target
= control target key end

     0   :  { %s34_s6 = smov [#allocation2]   ;;  %s35_s7 = smov [#allocation3]   ;;  %s53_s0 = inlined_call_operand.hbm [shape: f32[16,32], index: 0, kind: input, shape index: {}]   ;;  %s54_s1 = inlined_call_operand.hbm [shape: f32[16,32], index: 1, kind: output, shape index: {}]  }
   0x1   :  { %s36_s8 = smov 0  }
   0x2   :  { %18 = dma.general %s53_s0, 256, %s54_s1, %s34_s6, %s35_s7, [#allocation4], %s36_s8, 0  }
   0x3   :  { %32 = dma.done.wait [#allocation2], 256 }
   0x4   :  { %33 = vsyncadd [#allocation2], 4294967040 }
   0x5   :  { %22 = vsyncmov [#allocation2] }
   0x8   :  { %s23_s13 = vpop.sfrf %22 }
   0x9   :  { %p28_p0 = scmp.ne.s32.totalorder %s23_s13, 0 }
   0xb   :  { %27 = shalt.err (%p28_p0)  }

</bundles_post_ra>
